<compile_context>
chip_gen: v6e
topology: v6e:2x2x1
jax: 0.10.0
libtpu: 0.0.40
codegen_flags: <defaults>
</compile_context>

<pallas_src>
import functools

import numpy as np
import jax
import jax.numpy as jnp
from jax import lax
from jax.experimental import pallas as pl
from jax.experimental.pallas import tpu as pltpu


# Above the default scoped VMEM limit (16 MiB v5e / 32 MiB v6e+v7x), below
# v7x's 64 MiB physical VMEM.
_VMEM_LIMIT_BYTES = 48 * 1024 * 1024
# Per-grid-step streamed weight-noise budget (Pallas double-buffers it).
_MAX_NOISE_BLOCK_BYTES = 8 * 1024 * 1024


# ---------------------------------------------------------------------------
# Kernels
# ---------------------------------------------------------------------------
def _fused_mlp_kernel(*refs, num_layers):
    # refs = [x, wt_0, b_0, wt_1, b_1, ..., wt_{L-1}, b_{L-1}, out]
    x_ref, o_ref = refs[0], refs[-1]
    y = x_ref[...]                                     # (n, in)
    for i in range(num_layers):
        wt = refs[1 + 2 * i][...]                      # (in_i, out_i)
        b = refs[2 + 2 * i][...]                       # (1, out_i)
        y = jnp.dot(y, wt, preferred_element_type=jnp.float32) + b
        if i < num_layers - 1:                         # tanh on hidden layers only
            y = jnp.tanh(y)                            # EUP slot -> essentially free
    o_ref[...] = y.astype(o_ref.dtype)


def _fused_sampled_mlp_kernel(*refs, num_hidden, sb):
    # refs = [x, h0, wn0cat, bn0,
    #         (wt_i, b_i, wn_i, bn_i) for i = 1 .. num_hidden-1,
    #         w_out, b_out, out]
    x_ref, h0_ref, wn0_ref, bn0_ref = refs[:4]
    w_out_ref, b_out_ref, o_ref = refs[-3], refs[-2], refs[-1]
    mid = refs[4:-3]

    x = x_ref[...]                       # (n, in0)   shared across all samples
    h0 = h0_ref[...]                     # (n, out0)  hoisted x @ W0 + b0
    n = x.shape[0]
    out0 = h0.shape[1]

    # ---- layer 0: ONE lane-dense MXU matmul for the whole sample block ------
    # x @ [Wn0_j | ... | Wn0_{j+sb-1}]  -> (n, sb*out0); bf16 noise upcast here.
    z0 = jnp.dot(x, wn0_ref[...].astype(jnp.float32),
                 preferred_element_type=jnp.float32)
    ys = []
    for j in range(sb):
        zj = z0[:, j * out0:(j + 1) * out0]            # static, 128-aligned slice
        ys.append(jnp.tanh(h0 + zj + bn0_ref[j].astype(jnp.float32)))

    # ---- hidden layers 1 .. H-1 ----------------------------------------------
    for i in range(num_hidden - 1):
        wt_ref, b_ref, wn_ref, bn_ref = mid[4 * i: 4 * i + 4]
        y_all = jnp.concatenate(ys, axis=0)            # (sb*n, in_i) stacked slab
        # Shared-weight matmul once for all SB samples (good MXU M-utilization).
        z_sh = jnp.dot(y_all, wt_ref[...],
                       preferred_element_type=jnp.float32) + b_ref[...]
        new_ys = []
        for j in range(sb):
            # x @ (W + Wn) == x @ W + x @ Wn : second MXU push instead of a
            # full (in, out)-sized VPU add per sample.
            zn = jnp.dot(ys[j], wn_ref[j].astype(jnp.float32),
                         preferred_element_type=jnp.float32)
            new_ys.append(jnp.tanh(z_sh[j * n:(j + 1) * n, :] + zn
                                   + bn_ref[j].astype(jnp.float32)))
        ys = new_ys

    # ---- output layer (reference module applies no noise here) ---------------
    w_out = w_out_ref[...]               # (out_f, h_last)  ORIGINAL orientation
    b_out = b_out_ref[...]               # (out_f, 1)
    for j in range(sb):
        # NT matmul (contract both operands on the feature axis) -> (out_f, n):
        # the output is written transposed so the store is lane-dense in n.
        zt = lax.dot_general(w_out, ys[j], (((1,), (1,)), ((), ())),
                             preferred_element_type=jnp.float32) + b_out
        o_ref[j] = zt.astype(o_ref.dtype)


# ---------------------------------------------------------------------------
# Wrappers
# ---------------------------------------------------------------------------
def mlp_forward(x, params, *, vmem_limit_bytes=_VMEM_LIMIT_BYTES):
    """Deterministic fused forward. params: list of (wt [in,out], b [1,out])."""
    n = x.shape[0]
    out_f = params[-1][0].shape[1]
    flat = [x]
    for wt, b in params:
        flat += [wt, b]
    # TODO(synk): when any single weight exceeds a few MiB, switch to a K-tiled
    # grid + f32 accumulator (P3 pattern) instead of whole-array VMEM blocks.
    return pl.pallas_call(
        functools.partial(_fused_mlp_kernel, num_layers=len(params)),
        out_shape=jax.ShapeDtypeStruct((n, out_f), x.dtype),
        compiler_params=pltpu.CompilerParams(vmem_limit_bytes=vmem_limit_bytes),
    )(*flat)


def _divisors(s):
    return [d for d in range(1, s + 1) if s % d == 0]


def _pick_sample_block(s, out0, per_sample_noise_bytes,
                       max_block_bytes=_MAX_NOISE_BLOCK_BYTES):
    """Largest divisor of s whose streamed-noise block fits the budget and keeps
    the layer-0 concatenated noise block lane-aligned (sb*out0 % 128 == 0)."""
    valid = [d for d in _divisors(s)
             if ((d * out0) % 128 == 0 or d == s)
             and d * per_sample_noise_bytes <= max_block_bytes]
    return max(valid) if valid else s


def mlp_forward_sampled(x, hidden_params, out_w, out_b, noise, *,
                        sample_block=None, noise_dtype=jnp.bfloat16,
                        vmem_limit_bytes=_VMEM_LIMIT_BYTES):
    """Sampled fused forward.

    x:             (n, in) shared across samples.
    hidden_params: list of (wt [in,out] f32, b [1,out] f32) for hidden layers.
    out_w, out_b:  output layer in its ORIGINAL orientation (out_f, h_last) /
                   (out_f, 1), so the kernel can emit lane-dense transposed tiles.
    noise:         2 tensors per layer incl. the output layer (whose noise the
                   reference module ignores): wn_i (s, in_i, out_i), bn_i (s, out_i).
    """
    num_hidden = len(hidden_params)
    n, in0 = x.shape
    out_f = out_w.shape[0]
    s = noise[0].shape[0]

    if num_hidden == 0:
        # Output layer takes no noise in the reference module -> all samples equal.
        det = mlp_forward(x, [(jnp.transpose(out_w), out_b.reshape(1, out_f))],
                          vmem_limit_bytes=vmem_limit_bytes)
        return jnp.broadcast_to(det[None], (s, n, out_f))

    out0 = hidden_params[0][0].shape[1]
    per_sample_noise_bytes = (sum(wt.shape[0] * wt.shape[1] for wt, _ in hidden_params)
                              * np.dtype(noise_dtype).itemsize)
    if sample_block is None:
        sample_block = _pick_sample_block(s, out0, per_sample_noise_bytes)
    sb = int(sample_block)
    if s % sb != 0:
        raise ValueError(f"sample_block={sb} must divide the sample count s={s}")
    if (sb * out0) % 128 != 0 and sb != s:
        raise ValueError(
            f"sample_block={sb}: sb*out0={sb * out0} must be a multiple of 128 "
            "(layer-0 concatenated weight-noise block) or sb must equal s")
    # TODO(synk): when sb * per_sample_noise_bytes approaches the VMEM budget
    # (esp. v7x's 64 MiB physical VMEM), tile wn along in/out with extra
    # 'arbitrary' grid axes and an f32 accumulator instead of whole-layer blocks.

    # Hoist the sample-invariant layer-0 term once (tiny fused pallas_call);
    # done outside the sampled kernel on purpose (megacore-safe, see header).
    wt0, b0 = hidden_params[0]
    h0 = mlp_forward(x, [(wt0, b0)], vmem_limit_bytes=vmem_limit_bytes)  # (n, out0), no tanh

    # Layer-0 weight noise laid out as (in0, s*out0) so each grid step performs
    # ONE lane-dense (n, in0) @ (in0, sb*out0) MXU matmul instead of sb tiny ones.
    # (In a real pipeline the noise would be generated directly in this layout
    # and in bf16, avoiding the wrapper-side transpose/cast passes.)
    wn0c = jnp.transpose(noise[0], (1, 0, 2)).reshape(in0, s * out0).astype(noise_dtype)
    bn0 = noise[1].reshape(s, 1, out0)

    inputs = [x, h0, wn0c, bn0]
    in_specs = [
        pl.BlockSpec((n, in0), lambda si: (0, 0)),              # shared, stays resident
        pl.BlockSpec((n, out0), lambda si: (0, 0)),             # shared, stays resident
        pl.BlockSpec((in0, sb * out0), lambda si: (0, si)),     # bf16 stream, pipelined
        pl.BlockSpec((sb, 1, out0), lambda si: (si, 0, 0)),     # per-sample bias noise
    ]
    for i in range(1, num_hidden):
        wt, b = hidden_params[i]
        in_i, out_i = wt.shape
        wn = noise[2 * i].astype(noise_dtype)                   # (s, in_i, out_i) bf16
        bn = noise[2 * i + 1].reshape(s, 1, out_i)
        inputs += [wt, b, wn, bn]
        # TODO(synk): pipeline_mode=pl.Buffered(1) on the constant-index wt/b
        # specs (halves resident weight VMEM, v7x) and pl.Buffered(3) on the wn
        # stream (v5e) once pipeline_mode is reliable on the target jaxlib.
        in_specs += [
            pl.BlockSpec((in_i, out_i), lambda si: (0, 0)),     # shared, stays resident
            pl.BlockSpec((1, out_i), lambda si: (0, 0)),
            pl.BlockSpec((sb, in_i, out_i), lambda si: (si, 0, 0)),  # bf16 stream
            pl.BlockSpec((sb, 1, out_i), lambda si: (si, 0, 0)),
        ]
    inputs += [out_w, out_b]
    in_specs += [
        pl.BlockSpec(out_w.shape, lambda si: (0, 0)),
        pl.BlockSpec(out_b.shape, lambda si: (0, 0)),
    ]

    # Output produced transposed, (s, out_f, n): the store's lane axis is the
    # batch n instead of out_f (often 1 -> masked vst.msk), per the perf review.
    out_t = pl.pallas_call(
        functools.partial(_fused_sampled_mlp_kernel, num_hidden=num_hidden, sb=sb),
        out_shape=jax.ShapeDtypeStruct((s, out_f, n), x.dtype),
        grid=(s // sb,),
        in_specs=in_specs,
        out_specs=pl.BlockSpec((sb, out_f, n), lambda si: (si, 0, 0)),
        compiler_params=pltpu.CompilerParams(
            dimension_semantics=("parallel",),       # v7x: sample blocks across TCs
            vmem_limit_bytes=vmem_limit_bytes),
    )(*inputs)
    return jnp.transpose(out_t, (0, 2, 1))           # tiny: -> (s, n, out_f)


# ---------------------------------------------------------------------------
# MLPWithSampling (parameter setup in plain JAX, hot path in fused Pallas kernels)
# ---------------------------------------------------------------------------
class MLPWithSampling:
    """JAX/Pallas port of the PyTorch MLPWithSampling module (act = tanh)."""

    def __init__(self, input_size, hidden_sizes=(), output_size=1, key=None):
        self.input_size = int(input_size)
        self.output_size = int(output_size)
        hidden_sizes = list(hidden_sizes)
        self.num_hidden = len(hidden_sizes)
        sizes = [self.input_size] + hidden_sizes + [self.output_size]
        if key is None:
            key = jax.random.PRNGKey(0)
        self.params = []     # every layer: (wt [in,out], b [1,out]) pre-transposed
        last_raw = None
        for in_f, out_f in zip(sizes[:-1], sizes[1:]):
            key, kw, kb = jax.random.split(key, 3)
            bound = 1.0 / float(in_f) ** 0.5
            w = jax.random.uniform(kw, (out_f, in_f), jnp.float32, -bound, bound)
            b = jax.random.uniform(kb, (out_f,), jnp.float32, -bound, bound)
            self.params.append((jnp.transpose(w), b.reshape(1, out_f)))
            last_raw = (w, b)
        # Output layer additionally kept in its original (out,in) orientation so
        # the sampled kernel can emit transposed (lane-dense) output tiles.
        self.out_w = last_raw[0]                              # (out_f, h_last)
        self.out_b_col = last_raw[1].reshape(self.output_size, 1)

    def forward(self, x, noise=None, *, sample_block=None):
        if noise is None:
            return mlp_forward(x, self.params)
        assert len(noise) == 2 * len(self.params)
        assert all(noise[0].shape[0] == noise[i].shape[0]
                   for i in range(1, len(noise)))
        return mlp_forward_sampled(x, self.params[:-1], self.out_w, self.out_b_col,
                                   noise, sample_block=sample_block)


# ---------------------------------------------------------------------------
# Pure-JAX reference for verification
# ---------------------------------------------------------------------------
def _ref_forward(model, x, noise=None, noise_dtype=jnp.bfloat16):
    if noise is None:
        y = x
        for i in range(model.num_hidden):
            wt, b = model.params[i]
            y = jnp.tanh(y @ wt + b)
        wt, b = model.params[-1]
        return y @ wt + b
    s = noise[0].shape[0]
    y = jnp.broadcast_to(x, (s,) + x.shape)
    for i in range(model.num_hidden):
        wt, b = model.params[i]
        # Same bf16 storage rounding of the weight noise as the kernel path.
        wn = noise[2 * i].astype(noise_dtype).astype(jnp.float32)
        bn = noise[2 * i + 1]
        y = jnp.tanh(jnp.einsum("sni,sio->sno", y, wt[None] + wn)
                     + b + bn[:, None, :])
    wt, b = model.params[-1]
    return jnp.einsum("sni,io->sno", y, wt) + b


if __name__ == "__main__":
    key = jax.random.PRNGKey(0)
    # Small but hardware-friendly shapes: hidden sizes multiples of 128 (lane),
    # batch a multiple of 8 (sublane); output_size=1 exercises the lane-dense
    # transposed-output path.
    n, input_size, hidden_sizes, output_size, s = 8, 128, [128, 128], 1, 8

    k_model, k_x, k_noise = jax.random.split(key, 3)
    model = MLPWithSampling(input_size, hidden_sizes, output_size, key=k_model)
    x = jax.random.normal(k_x, (n, input_size), jnp.float32)

    # One noise tensor per parameter (weight & bias of every layer, incl. the
    # output layer, whose noise the reference module ignores).
    sizes = [input_size] + hidden_sizes + [output_size]
    noise = []
    for in_f, out_f in zip(sizes[:-1], sizes[1:]):
        k_noise, kw, kb = jax.random.split(k_noise, 3)
        noise.append(0.05 * jax.random.normal(kw, (s, in_f, out_f), jnp.float32))
        noise.append(0.05 * jax.random.normal(kb, (s, out_f), jnp.float32))

    # Deterministic forward: one fused pallas_call.
    y_det = jax.block_until_ready(model.forward(x))
    y_det_ref = _ref_forward(model, x)
    assert y_det.shape == (n, output_size)
    assert jnp.allclose(y_det, y_det_ref, atol=1e-4, rtol=1e-4), (
        float(jnp.max(jnp.abs(y_det - y_det_ref))))

    # Sampled forward: one fused pallas_call, 4 samples per grid step -> grid=(2,)
    # (exercises the pipelined multi-block path; the heuristic would pick 8 here).
    y_samp = jax.block_until_ready(model.forward(x, noise, sample_block=4))
    y_samp_ref = _ref_forward(model, x, noise)
    assert y_samp.shape == (s, n, output_size)
    assert jnp.allclose(y_samp, y_samp_ref, atol=1e-4, rtol=1e-4), (
        float(jnp.max(jnp.abs(y_samp - y_samp_ref))))

    print("KERNEL_OK")
</pallas_src>

<mosaic_0001>
module attributes {stable_mosaic.version = 11 : i64} {
  func.func @_fused_mlp_kernel(%arg0: memref<8x128xf32, #tpu.memory_space<vmem>>, %arg1: memref<128x128xf32, #tpu.memory_space<vmem>>, %arg2: memref<1x128xf32, #tpu.memory_space<vmem>>, %arg3: memref<128x128xf32, #tpu.memory_space<vmem>>, %arg4: memref<1x128xf32, #tpu.memory_space<vmem>>, %arg5: memref<128x1xf32, #tpu.memory_space<vmem>>, %arg6: memref<1x1xf32, #tpu.memory_space<vmem>>, %arg7: memref<8x1xf32, #tpu.memory_space<vmem>>) attributes {dimension_semantics = [], scalar_prefetch = 0 : i64, scratch_operands = 0 : i64, tpu.core_type = #tpu.core_type<tc>} {
    %c0 = arith.constant 0 : index
    %c0_0 = arith.constant 0 : index
    %0 = vector.load %arg0[%c0, %c0_0] : memref<8x128xf32, #tpu.memory_space<vmem>>, vector<8x128xf32>
    %c0_1 = arith.constant 0 : index
    %c0_2 = arith.constant 0 : index
    %1 = vector.load %arg1[%c0_1, %c0_2] : memref<128x128xf32, #tpu.memory_space<vmem>>, vector<128x128xf32>
    %c0_3 = arith.constant 0 : index
    %c0_4 = arith.constant 0 : index
    %2 = vector.load %arg2[%c0_3, %c0_4] : memref<1x128xf32, #tpu.memory_space<vmem>>, vector<1x128xf32>
    %cst = arith.constant dense<0.000000e+00> : vector<8x128xf32>
    %3 = tpu.matmul %0, %1, %cst {dimension_numbers = #tpu.dot_dimension_numbers<[1], [0], [0], [1], [0, 0, 1, 1], [], []>} : vector<8x128xf32>, vector<128x128xf32>, vector<8x128xf32> -> vector<8x128xf32>
    %4 = vector.broadcast %2 : vector<1x128xf32> to vector<8x128xf32>
    %5 = arith.addf %3, %4 : vector<8x128xf32>
    %6 = math.tanh %5 : vector<8x128xf32>
    %c0_5 = arith.constant 0 : index
    %c0_6 = arith.constant 0 : index
    %7 = vector.load %arg3[%c0_5, %c0_6] : memref<128x128xf32, #tpu.memory_space<vmem>>, vector<128x128xf32>
    %c0_7 = arith.constant 0 : index
    %c0_8 = arith.constant 0 : index
    %8 = vector.load %arg4[%c0_7, %c0_8] : memref<1x128xf32, #tpu.memory_space<vmem>>, vector<1x128xf32>
    %cst_9 = arith.constant dense<0.000000e+00> : vector<8x128xf32>
    %9 = tpu.matmul %6, %7, %cst_9 {dimension_numbers = #tpu.dot_dimension_numbers<[1], [0], [0], [1], [0, 0, 1, 1], [], []>} : vector<8x128xf32>, vector<128x128xf32>, vector<8x128xf32> -> vector<8x128xf32>
    %10 = vector.broadcast %8 : vector<1x128xf32> to vector<8x128xf32>
    %11 = arith.addf %9, %10 : vector<8x128xf32>
    %12 = math.tanh %11 : vector<8x128xf32>
    %c0_10 = arith.constant 0 : index
    %c0_11 = arith.constant 0 : index
    %13 = vector.load %arg5[%c0_10, %c0_11] : memref<128x1xf32, #tpu.memory_space<vmem>>, vector<128x1xf32>
    %c0_12 = arith.constant 0 : index
    %c0_13 = arith.constant 0 : index
    %14 = vector.load %arg6[%c0_12, %c0_13] : memref<1x1xf32, #tpu.memory_space<vmem>>, vector<1x1xf32>
    %cst_14 = arith.constant dense<0.000000e+00> : vector<8x1xf32>
    %15 = tpu.matmul %12, %13, %cst_14 {dimension_numbers = #tpu.dot_dimension_numbers<[1], [0], [0], [1], [0, 0, 1, 1], [], []>} : vector<8x128xf32>, vector<128x1xf32>, vector<8x1xf32> -> vector<8x1xf32>
    %16 = vector.broadcast %14 : vector<1x1xf32> to vector<8x1xf32>
    %17 = arith.addf %15, %16 : vector<8x1xf32>
    %c0_15 = arith.constant 0 : index
    %c0_16 = arith.constant 0 : index
    %18 = vector.load %arg7[%c0_15, %c0_16] : memref<8x1xf32, #tpu.memory_space<vmem>>, vector<8x1xf32>
    tpu.vector_store %arg7[%c0_15, %c0_16], %17 {strides = array<i32>} : memref<8x1xf32, #tpu.memory_space<vmem>>, vector<8x1xf32>,
    return
  }
}

</mosaic_0001>

<bundles_post_ra>
// kernel: tpu_custom_call.1
= control target key start
LH: loop header
LB: loop body
LE: loop exit
PB: predicated region body
PF: predicated region fallthrough
CT: control target
= control target key end

     0   :  { %s771_s0 = inlined_call_operand.hbm [shape: f32[8,128], index: 0, kind: input, shape index: {}]   ;;  %s772_s1 = inlined_call_operand.vmem [shape: f32[128,128], index: 1, kind: input, shape index: {}]   ;;  %s773_s2 = inlined_call_operand.vmem [shape: f32[1,128], index: 2, kind: input, shape index: {}]   ;;  %s774_s3 = inlined_call_operand.hbm [shape: f32[128,128], index: 3, kind: input, shape index: {}]   ;;  %s775_s4 = inlined_call_operand.vmem [shape: f32[1,128], index: 4, kind: input, shape index: {}]   ;;  %s776_s5 = inlined_call_operand.vmem [shape: f32[128,1], index: 5, kind: input, shape index: {}]   ;;  %s777_s6 = inlined_call_operand.<no memory space> [shape: f32[1,1], index: 6, kind: input, shape index: {}]   ;;  %s778_s7 = inlined_call_operand.vmem [shape: f32[8,1], index: 7, kind: output, shape index: {}]  }
   0x1   :  { %v12_v0 = vstv %s777_s6 }
   0x2   :  { %13 = vst [vmem:[#allocation2] sm:$0x1] %v12_v0 }
   0x3   :  { %14 = vsyncpa [#allocation4], 0 }
   0x4   :  { %15 = vsyncpa [#allocation6], 0  ;;  %s557_s26 = smov [#allocation3]   ;;  %s558_s28 = smov [#allocation5]  }
   0x5   :  { %s22_s27 = sshll.u32 %s557_s26, 4  ;;  %s35_s29 = sshll.u32 %s558_s28, 4  ;;  %s23_s27 = int_to_ptr.vmem [resolvable:$true] %s22_s27  ;;  %s36_s29 = int_to_ptr.vmem [resolvable:$true] %s35_s29 }
   0x6   :  { %s521_s30 = scalar_lea.vmem %s23_s27, 128  ;;  %p526_p1 = scmp.lt.s32.totalorder %s23_s27, %s23_s27 }
   0x7   :  { %p522_p0 = scmp.ne.s32.totalorder %s23_s27, %s521_s30  ;;  %p527_p2 = scmp.lt.s32.totalorder %s521_s30, %s521_s30 }
   0x9   :  { %p528_p3 = por %p527_p2, %p526_p1 }
   0xb   :  { %p529_p4 = pnand %p528_p3, %p522_p0 }
   0xd   :  { %532 = shalt.err (!%p529_p4)
}
   0xe   :  { %25 = dma.hbm_to_vmem [thread:$0]  %s771_s0, 128, %s23_s27, [#allocation4]  }
   0xf   :  { %s541_s6 = scalar_lea.vmem %s36_s29, 2048  ;;  %p546_p6 = scmp.lt.s32.totalorder %s36_s29, %s36_s29 }
  0x10   :  { %p542_p5 = scmp.ne.s32.totalorder %s36_s29, %s541_s6  ;;  %p547_p7 = scmp.lt.s32.totalorder %s541_s6, %s541_s6 }
  0x12   :  { %p548_p8 = por %p547_p7, %p546_p6 }
  0x14   :  { %p549_p9 = pnand %p548_p8, %p542_p5 }
  0x16   :  { %552 = shalt.err (!%p549_p9)
}
  0x17   :  { %s559_s10 = smov 128   ;;  %s560_s11 = smov 8  }
  0x18   :  { %41 = dma.hbm_to_vmem [thread:$0]  %s774_s3, 2048, %s36_s29, [#allocation6], %s559_s10, %s559_s10, %s560_s11  }
  0x19   :  { %553 = dma.done.wait [#allocation4], 128  }
  0x1a   :  { %554 = vsyncadd [#allocation4], 4294967168 }
  0x1b   :  { %555 = dma.done.wait [#allocation6], 2048  }
  0x1c   :  { %556 = vsyncadd [#allocation6], 4294965248  ;;  %v561_v1 = vmov 0.0   ;;  %vm562_vm0 = vmmov 0   ;;  %v70_v2 = vld [vmem:[%s772_s1 + $0x78] sm:$0xff]  ;;  %v69_v3 = vld [vmem:[%s772_s1 + $0x70] sm:$0xff] }
  0x1d   :  { %398 = vmatprep.subr.mxu0 %v561_v1  ;;  %430 = vmatprep.mubr.msk.f32.mxu0 %vm562_vm0, %v561_v1  ;;  %v68_v4 = vld [vmem:[%s772_s1 + $0x68] sm:$0xff]  ;;  %v67_v5 = vld [vmem:[%s772_s1 + $0x60] sm:$0xff]  ;;  %v66_v7 = vld [vmem:[%s772_s1 + $0x58] sm:$0xff]  ;;  %vm336_vm1 = vcmask 7168  }
  0x1e   :  { %433 = vmatprep.subr.mxu1 %v561_v1  ;;  %465 = vmatprep.mubr.msk.f32.mxu1 %vm562_vm0, %v561_v1  ;;  %v164_v6 = vld [vmem:[#allocation5 + $0x78] sm:$0xff]  ;;  %v163_v8 = vld [vmem:[#allocation5 + $0x70] sm:$0xff]  ;;  %v162_v9 = vld [vmem:[#allocation5 + $0x68] sm:$0xff] }
  0x1f   :  { %399 = vmatpush3.msra.mxu0 %v70_v2  ;;  %434 = vmatpush3.msra.mxu1 %v164_v6  ;;  %v65_v10 = vld [vmem:[%s772_s1 + $0x50] sm:$0xff]  ;;  %v64_v12 = vld [vmem:[%s772_s1 + $0x48] sm:$0xff]  ;;  %v63_v14 = vld [vmem:[%s772_s1 + $0x40] sm:$0xff] }
  0x20   :  { %400 = vmatprep.subr.mxu0 %v561_v1  ;;  %435 = vmatprep.subr.mxu1 %v561_v1  ;;  %v161_v11 = vld [vmem:[#allocation5 + $0x60] sm:$0xff]  ;;  %v160_v13 = vld [vmem:[#allocation5 + $0x58] sm:$0xff]  ;;  %v159_v15 = vld [vmem:[#allocation5 + $0x50] sm:$0xff] }
  0x21   :  { %401 = vmatpush3.msra.mxu0 %v69_v3  ;;  %436 = vmatpush3.msra.mxu1 %v163_v8  ;;  %v62_v16 = vld [vmem:[%s772_s1 + $0x38] sm:$0xff]  ;;  %v61_v18 = vld [vmem:[%s772_s1 + $0x30] sm:$0xff]  ;;  %v60_v19 = vld [vmem:[%s772_s1 + $0x28] sm:$0xff] }
  0x22   :  { %402 = vmatprep.subr.mxu0 %v561_v1  ;;  %437 = vmatprep.subr.mxu1 %v561_v1  ;;  %v158_v17 = vld [vmem:[#allocation5 + $0x48] sm:$0xff]  ;;  %v59_v20 = vld [vmem:[%s772_s1 + $0x20] sm:$0xff]  ;;  %v56_v23 = vld [vmem:[%s772_s1 + $0x8] sm:$0xff] }
  0x23   :  { %403 = vmatpush3.msra.mxu0 %v68_v4  ;;  %438 = vmatpush3.msra.mxu1 %v162_v9  ;;  %v58_v21 = vld [vmem:[%s772_s1 + $0x18] sm:$0xff]  ;;  %v57_v22 = vld [vmem:[%s772_s1 + $0x10] sm:$0xff]  ;;  %v55_v24 = vld [vmem:[%s772_s1] sm:$0xff] }
  0x24   :  { %404 = vmatprep.subr.mxu0 %v561_v1  ;;  %439 = vmatprep.subr.mxu1 %v561_v1  ;;  %v54_v25 = vld [vmem:[#allocation3] sm:$0xff]  ;;  %v157_v26 = vld [vmem:[#allocation5 + $0x40] sm:$0xff]  ;;  %v155_v28 = vld [vmem:[#allocation5 + $0x30] sm:$0xff] }
  0x25   :  { %405 = vmatpush3.msra.mxu0 %v67_v5  ;;  %440 = vmatpush3.msra.mxu1 %v161_v11  ;;  %v156_v27 = vld [vmem:[#allocation5 + $0x38] sm:$0xff]  ;;  %v154_v29 = vld [vmem:[#allocation5 + $0x28] sm:$0xff]  ;;  %v153_v30 = vld [vmem:[#allocation5 + $0x20] sm:$0xff] }
  0x26   :  { %406 = vmatprep.subr.mxu0 %v561_v1  ;;  %441 = vmatprep.subr.mxu1 %v561_v1  ;;  %v152_v31 = vld [vmem:[#allocation5 + $0x18] sm:$0xff]  ;;  %v151_v32 = vld [vmem:[#allocation5 + $0x10] sm:$0xff]  ;;  %v150_v33 = vld [vmem:[#allocation5 + $0x8] sm:$0xff] }
  0x27   :  { %407 = vmatpush3.msra.mxu0 %v66_v7  ;;  %442 = vmatpush3.msra.mxu1 %v160_v13  ;;  %v149_v34 = vld [vmem:[#allocation5] sm:$0xff]  ;;  %v258_v35 = vld [vmem:[%s776_s5 + $0x78] sm:$0xff]  ;;  %v255_v38 = vld [vmem:[%s776_s5 + $0x60] sm:$0xff] }
  0x28   :  { %408 = vmatprep.subr.mxu0 %v561_v1  ;;  %443 = vmatprep.subr.mxu1 %v561_v1  ;;  %v257_v36 = vld [vmem:[%s776_s5 + $0x70] sm:$0xff]  ;;  %v256_v37 = vld [vmem:[%s776_s5 + $0x68] sm:$0xff]  ;;  %v254_v39 = vld [vmem:[%s776_s5 + $0x58] sm:$0xff] }
  0x29   :  { %409 = vmatpush3.msra.mxu0 %v65_v10  ;;  %444 = vmatpush3.msra.mxu1 %v159_v15  ;;  %v253_v40 = vld [vmem:[%s776_s5 + $0x50] sm:$0xff]  ;;  %v252_v41 = vld [vmem:[%s776_s5 + $0x48] sm:$0xff]  ;;  %v344_v42 = vld [vmem:[%s773_s2] ss:$0 sm:$0xff] }
  0x2a   :  { %410 = vmatprep.subr.mxu0 %v561_v1  ;;  %445 = vmatprep.subr.mxu1 %v561_v1  ;;  %v251_v47 = vld [vmem:[%s776_s5 + $0x40] sm:$0xff]  ;;  %v250_v48 = vld [vmem:[%s776_s5 + $0x38] sm:$0xff]  ;;  %v249_v49 = vld [vmem:[%s776_s5 + $0x30] sm:$0xff] }
  0x2b   :  { %411 = vmatpush3.msra.mxu0 %v64_v12  ;;  %446 = vmatpush3.msra.mxu1 %v158_v17  ;;  %v248_v50 = vld [vmem:[%s776_s5 + $0x28] sm:$0xff]  ;;  %v247_v51 = vld [vmem:[%s776_s5 + $0x20] sm:$0xff]  ;;  %v246_v52 = vld [vmem:[%s776_s5 + $0x18] sm:$0xff] }
  0x2c   :  { %412 = vmatprep.subr.mxu0 %v561_v1  ;;  %447 = vmatprep.subr.mxu1 %v561_v1  ;;  %v245_v53 = vld [vmem:[%s776_s5 + $0x10] sm:$0xff]  ;;  %v244_v54 = vld [vmem:[%s776_s5 + $0x8] sm:$0xff]  ;;  %v243_v55 = vld [vmem:[%s776_s5] sm:$0xff] }
  0x2d   :  { %413 = vmatpush3.msra.mxu0 %v63_v14  ;;  %448 = vmatpush3.msra.mxu1 %v157_v26  ;;  %v345_v56 = vld [vmem:[%s775_s4] ss:$0 sm:$0xff] }
  0x2e   :  { %414 = vmatprep.subr.mxu0 %v561_v1  ;;  %449 = vmatprep.subr.mxu1 %v561_v1  ;;  %v346_v61 = vld [vmem:[#allocation2] ss:$0 sm:$0xff] }
  0x2f   :  { %415 = vmatpush3.msra.mxu0 %v62_v16  ;;  %450 = vmatpush3.msra.mxu1 %v156_v27 }
  0x30   :  { %416 = vmatprep.subr.mxu0 %v561_v1  ;;  %451 = vmatprep.subr.mxu1 %v561_v1 }
  0x31   :  { %417 = vmatpush3.msra.mxu0 %v61_v18  ;;  %452 = vmatpush3.msra.mxu1 %v155_v28 }
  0x32   :  { %418 = vmatprep.subr.mxu0 %v561_v1  ;;  %453 = vmatprep.subr.mxu1 %v561_v1 }
  0x33   :  { %419 = vmatpush3.msra.mxu0 %v60_v19  ;;  %454 = vmatpush3.msra.mxu1 %v154_v29 }
  0x34   :  { %420 = vmatprep.subr.mxu0 %v561_v1  ;;  %455 = vmatprep.subr.mxu1 %v561_v1 }
  0x35   :  { %421 = vmatpush3.msra.mxu0 %v59_v20  ;;  %456 = vmatpush3.msra.mxu1 %v153_v30 }
  0x36   :  { %422 = vmatprep.subr.mxu0 %v561_v1  ;;  %457 = vmatprep.subr.mxu1 %v561_v1 }
  0x37   :  { %423 = vmatpush3.msra.mxu0 %v58_v21  ;;  %458 = vmatpush3.msra.mxu1 %v152_v31 }
  0x38   :  { %424 = vmatprep.subr.mxu0 %v561_v1  ;;  %459 = vmatprep.subr.mxu1 %v561_v1 }
  0x39   :  { %425 = vmatpush3.msra.mxu0 %v57_v22  ;;  %460 = vmatpush3.msra.mxu1 %v151_v32 }
  0x3a   :  { %426 = vmatprep.subr.mxu0 %v561_v1  ;;  %461 = vmatprep.subr.mxu1 %v561_v1 }
  0x3b   :  { %427 = vmatpush3.msra.mxu0 %v56_v23  ;;  %462 = vmatpush3.msra.mxu1 %v150_v33 }
  0x3c   :  { %428 = vmatprep.subr.mxu0 %v561_v1  ;;  %463 = vmatprep.subr.mxu1 %v561_v1 }
  0x3d   :  { %429 = vmatpush3.msra.mxu0 %v55_v24  ;;  %464 = vmatpush3.msra.mxu1 %v149_v34 }
  0x3e   :  { %431 = vmatmul.mubr.f32.vlgmr.msra.gmra.mxu0 %v54_v25  ;;  %468 = vmatprep.subr.mxu0 %v561_v1 }
  0x3f   :  { %500 = vmatprep.mubr.msk.f32.mxu0 %vm562_vm0, %v561_v1  ;;  %469 = vmatpush3.msra.mxu0 %v258_v35 }
  0x40   :  { %470 = vmatprep.subr.mxu0 %v561_v1 }
  0x41   :  { %471 = vmatpush3.msra.mxu0 %v257_v36 }
  0x42   :  { %472 = vmatprep.subr.mxu0 %v561_v1 }
  0x43   :  { %473 = vmatpush3.msra.mxu0 %v256_v37 }
  0x44   :  { %474 = vmatprep.subr.mxu0 %v561_v1 }
  0x45   :  { %475 = vmatpush3.msra.mxu0 %v255_v38 }
  0x46   :  { %476 = vmatprep.subr.mxu0 %v561_v1 }
  0x47   :  { %477 = vmatpush3.msra.mxu0 %v254_v39 }
  0x48   :  { %478 = vmatprep.subr.mxu0 %v561_v1 }
  0x49   :  { %479 = vmatpush3.msra.mxu0 %v253_v40 }
  0x4a   :  { %480 = vmatprep.subr.mxu0 %v561_v1 }
  0x4b   :  { %481 = vmatpush3.msra.mxu0 %v252_v41 }
  0x4c   :  { %482 = vmatprep.subr.mxu0 %v561_v1 }
  0x4d   :  { %483 = vmatpush3.msra.mxu0 %v251_v47 }
  0x4e   :  { %484 = vmatprep.subr.mxu0 %v561_v1 }
  0x4f   :  { %485 = vmatpush3.msra.mxu0 %v250_v48 }
  0x50   :  { %486 = vmatprep.subr.mxu0 %v561_v1 }
  0x51   :  { %487 = vmatpush3.msra.mxu0 %v249_v49 }
  0x52   :  { %488 = vmatprep.subr.mxu0 %v561_v1 }
  0x53   :  { %489 = vmatpush3.msra.mxu0 %v248_v50 }
  0x54   :  { %490 = vmatprep.subr.mxu0 %v561_v1 }
  0x55   :  { %491 = vmatpush3.msra.mxu0 %v247_v51 }
  0x56   :  { %492 = vmatprep.subr.mxu0 %v561_v1 }
  0x57   :  { %493 = vmatpush3.msra.mxu0 %v246_v52 }
  0x58   :  { %494 = vmatprep.subr.mxu0 %v561_v1 }
  0x59   :  { %495 = vmatpush3.msra.mxu0 %v245_v53 }
  0x5a   :  { %496 = vmatprep.subr.mxu0 %v561_v1 }
  0x5b   :  { %497 = vmatpush3.msra.mxu0 %v244_v54 }
  0x5c   :  { %498 = vmatprep.subr.mxu0 %v561_v1 }
  0x5d   :  { %499 = vmatpush3.msra.mxu0 %v243_v55 }
  0xfe   :  { %v144_v43 = vpop.f32.mrf.mxu0 }
  0xff   :  { %v145_v44 = vadd.f32 %v344_v42, %v144_v43 }
 0x100   :  { %v432_v45 = vpop.f32.mrf.mxu0 }
 0x101   :  { %509 = vtanh.f32 %v145_v44 }
 0x10e   :  { %v510_v46 = vpop.eup %509 }
 0x10f   :  { %466 = vmatmul.mubr.f32.vlgmr.msra.gmra.mxu1 %v510_v46 }
 0x1cf   :  { %v238_v57 = vpop.f32.mrf.mxu1 }
 0x1d0   :  { %v239_v58 = vadd.f32 %v345_v56, %v238_v57 }
 0x1d1   :  { %v467_v59 = vpop.f32.mrf.mxu1 }
 0x1d2   :  { %511 = vtanh.f32 %v239_v58 }
 0x1df   :  { %v512_v60 = vpop.eup %511 }
 0x1e0   :  { %501 = vmatmul.mubr.f32.vlgmr.msra.gmra.mxu0 %v512_v60 }
 0x2a0   :  { %v332_v62 = vpop.f32.mrf.mxu0 }
 0x2a1   :  { %v333_v63 = vadd.f32 %v346_v61, %v332_v62 }
 0x2a2   :  { %v502_v0 = vpop.f32.mrf.mxu0 }
 0x2a3   :  { %337 = vst.msk [vmem:[%s778_s7] sm:$0xff] %vm336_vm1, %v333_v63 }
 0x2a4   :  { %342 = vsyncpa [#allocation4], 1 }
 0x2a5   :  { %343 = vsyncpa [#allocation6], 1 }

</bundles_post_ra>
